<compile_context>
chip_gen: v7x
topology: tpu7x:2x2x1
jax: 0.10.0
libtpu: 0.0.40
codegen_flags: <defaults>
</compile_context>

<pallas_src>
import jax
import jax.numpy as jnp
from jax.experimental import pallas as pl
from jax.experimental.pallas import tpu as pltpu


# ----------------------------------------------------------------------------
# Kernel
# ----------------------------------------------------------------------------
def _make_rnn_kernel(S, C, H1, H2):
    """Builds the per-timestep RNN-cell kernel, closed over static sizes."""

    def kernel(x0_ref, u_ref, h0_ref, w1_ref, wr_ref, wo_ref, b_ref,
               xseq_ref, hout_ref, x_sc, h_sc):
        t = pl.program_id(0)

        # Prime the recurrent state in VMEM scratch on the first step; it then
        # stays resident for the whole sequence (no HBM round trips).
        @pl.when(t == 0)
        def _init():
            x_sc[...] = x0_ref[...].astype(jnp.float32)
            h_sc[...] = h0_ref[...].astype(jnp.float32)

        x = x_sc[...]                                   # [B, S]
        h = h_sc[...]                                   # [B, H2]
        u = u_ref[...].astype(jnp.float32)              # [B, C] (time dim squeezed)

        b = b_ref[...]                                  # [1, H1+H2+S] packed biases
        b1 = b[:, :H1]
        bh = b[:, H1:H1 + H2]
        bo = b[:, H1 + H2:]

        # Layer 1: in-VMEM concat (no HBM-materialised z), single matmul.
        zu = jnp.concatenate([x, u], axis=-1)           # [B, S+C]
        h1 = jnp.tanh(
            jnp.dot(zu, w1_ref[...], preferred_element_type=jnp.float32) + b1)

        # Recurrent cell: single fused matmul  [h1 | h] @ [Wh; Uh].
        hr = jnp.concatenate([h1, h], axis=-1)          # [B, H1+H2]
        hnew = jnp.tanh(
            jnp.dot(hr, wr_ref[...], preferred_element_type=jnp.float32) + bh)

        # Output head + residual next-state.
        xnew = x + jnp.dot(hnew, wo_ref[...],
                           preferred_element_type=jnp.float32) + bo

        # Carry state for the next step; emit this step's prediction.
        x_sc[...] = xnew
        h_sc[...] = hnew
        xseq_ref[...] = xnew.astype(xseq_ref.dtype)
        hout_ref[...] = hnew.astype(hout_ref.dtype)

    return kernel


# ----------------------------------------------------------------------------
# Wrappers
# ----------------------------------------------------------------------------
def net_rollout(packed, x0, u_seq, latent=None):
    """Run T recurrent steps inside ONE pallas_call (grid over time).

    Returns (x_seq [T,B,S], latent_T [B,H2]).
    """
    T, B, C = u_seq.shape
    S = x0.shape[-1]
    H1 = packed["w1"].shape[-1]
    H2 = packed["wr"].shape[-1]
    if latent is None:
        latent = jnp.zeros((B, H2), dtype=x0.dtype)

    kernel = _make_rnn_kernel(S, C, H1, H2)
    inv2 = lambda t: (0, 0)  # grid-invariant 2-D operand (stays in VMEM)

    grid_spec = pltpu.PrefetchScalarGridSpec(
        num_scalar_prefetch=0,
        grid=(T,),
        in_specs=[
            pl.BlockSpec((B, S), inv2),                       # x0
            pl.BlockSpec((None, B, C), lambda t: (t, 0, 0)),  # u[t] (streamed)
            pl.BlockSpec((B, H2), inv2),                      # latent0
            pl.BlockSpec(packed["w1"].shape, inv2),           # W1      [S+C, H1]
            pl.BlockSpec(packed["wr"].shape, inv2),           # [Wh;Uh] [H1+H2, H2]
            pl.BlockSpec(packed["wo"].shape, inv2),           # Wo      [H2, S]
            pl.BlockSpec(packed["b"].shape, inv2),            # packed biases
        ],
        out_specs=(
            pl.BlockSpec((None, B, S), lambda t: (t, 0, 0)),  # xnew[t] (streamed)
            pl.BlockSpec((B, H2), inv2),                      # final latent (resident)
        ),
        scratch_shapes=[
            pltpu.VMEM((B, S), jnp.float32),                  # x carry
            pltpu.VMEM((B, H2), jnp.float32),                 # latent carry
        ],
    )

    flops = 2 * T * B * ((S + C) * H1 + (H1 + H2) * H2 + H2 * S)
    bytes_accessed = 4 * (x0.size + u_seq.size + latent.size
                          + packed["w1"].size + packed["wr"].size
                          + packed["wo"].size + packed["b"].size
                          + T * B * S + B * H2)
    cost = pl.CostEstimate(flops=flops,
                           transcendentals=T * B * (H1 + H2),
                           bytes_accessed=bytes_accessed)

    x_seq, latent_T = pl.pallas_call(
        kernel,
        grid_spec=grid_spec,
        out_shape=(
            jax.ShapeDtypeStruct((T, B, S), x0.dtype),
            jax.ShapeDtypeStruct((B, H2), x0.dtype),
        ),
        # Updated latent overwrites the incoming latent buffer (in-place state).
        input_output_aliases={2: 1},
        compiler_params=pltpu.CompilerParams(
            dimension_semantics=("arbitrary",)),  # time axis is a true recurrence
        cost_estimate=cost,
    )(x0, u_seq, latent, packed["w1"], packed["wr"], packed["wo"], packed["b"])
    return x_seq, latent_T


def net_forward(packed, x, u, latent=None):
    """Single-step forward matching Net.forward(x, u, latent) -> (xnew, latent)."""
    x_seq, latent_new = net_rollout(packed, x, u[None], latent)
    return x_seq[0], latent_new


# ----------------------------------------------------------------------------
# Parameters
# ----------------------------------------------------------------------------
def init_params(key, state_size, control_size, h_1=32, h_2=32, dtype=jnp.float32):
    """Deterministic nn.Linear-style init (uniform +/- 1/sqrt(fan_in))."""
    def linear(k, fan_in, fan_out):
        kw, kb = jax.random.split(k)
        bound = 1.0 / jnp.sqrt(jnp.asarray(fan_in, dtype))
        w = jax.random.uniform(kw, (fan_in, fan_out), dtype, -bound, bound)
        b = jax.random.uniform(kb, (1, fan_out), dtype, -bound, bound)
        return w, b

    k1, k2, k3, k4 = jax.random.split(key, 4)
    w1, b1 = linear(k1, state_size + control_size, h_1)
    wh, bh = linear(k2, h_1, h_2)
    uh, _ = linear(k3, h_2, h_2)
    wo, bo = linear(k4, h_2, state_size)
    return dict(w1=w1, b1=b1, wh=wh, uh=uh, bh=bh, wo=wo, bo=bo)


def pack_params(params):
    """One-time packing: stack [Wh; Uh] and pack the three biases."""
    return dict(
        w1=params["w1"],                                                   # [S+C, H1]
        wr=jnp.concatenate([params["wh"], params["uh"]], axis=0),          # [H1+H2, H2]
        wo=params["wo"],                                                   # [H2, S]
        b=jnp.concatenate([params["b1"], params["bh"], params["bo"]], -1), # [1, H1+H2+S]
    )


# ----------------------------------------------------------------------------
# Pure-JAX references
# ----------------------------------------------------------------------------
def net_forward_ref(params, x, u, latent=None):
    B = x.shape[0]
    h_2 = params["uh"].shape[0]
    if latent is None:
        latent = jnp.zeros((B, h_2), dtype=x.dtype)
    z = jnp.concatenate([x, u], axis=-1)
    h1 = jnp.tanh(z @ params["w1"] + params["b1"])
    hnew = jnp.tanh(h1 @ params["wh"] + latent @ params["uh"] + params["bh"])
    xnew = x + hnew @ params["wo"] + params["bo"]
    return xnew, hnew


def net_rollout_ref(params, x0, u_seq, latent=None):
    B = x0.shape[0]
    h_2 = params["uh"].shape[0]
    if latent is None:
        latent = jnp.zeros((B, h_2), dtype=x0.dtype)

    def step(carry, u_t):
        x, h = carry
        xn, hn = net_forward_ref(params, x, u_t, h)
        return (xn, hn), xn

    (_, latent_T), x_seq = jax.lax.scan(step, (x0, latent), u_seq)
    return x_seq, latent_T


# ----------------------------------------------------------------------------
# Test
# ----------------------------------------------------------------------------
if __name__ == "__main__":
    B, STATE, CONTROL, H1, H2, T = 2, 4, 2, 32, 32, 8

    key = jax.random.PRNGKey(0)
    kp, kx, ku, kl, ks = jax.random.split(key, 5)
    params = init_params(kp, STATE, CONTROL, H1, H2)
    packed = pack_params(params)

    x = jax.random.normal(kx, (B, STATE), jnp.float32)
    u = jax.random.normal(ku, (B, CONTROL), jnp.float32)
    latent = jax.random.normal(kl, (B, H2), jnp.float32)
    u_seq = jax.random.normal(ks, (T, B, CONTROL), jnp.float32)

    # Single-step forward (module semantics).
    fwd = jax.jit(net_forward)
    xnew, latent_new = fwd(packed, x, u, latent)
    jax.block_until_ready((xnew, latent_new))
    xnew_ref, latent_ref = net_forward_ref(params, x, u, latent)
    assert xnew.shape == (B, STATE) and latent_new.shape == (B, H2)
    assert jnp.allclose(xnew, xnew_ref, atol=1e-5), "single-step xnew mismatch"
    assert jnp.allclose(latent_new, latent_ref, atol=1e-5), "single-step latent mismatch"

    # latent=None path (fresh hidden state).
    x2, l2 = fwd(packed, x, u)
    jax.block_until_ready((x2, l2))
    x2_ref, l2_ref = net_forward_ref(params, x, u)
    assert jnp.allclose(x2, x2_ref, atol=1e-5)
    assert jnp.allclose(l2, l2_ref, atol=1e-5)

    # Multi-step rollout: weights + latent stay resident in VMEM across T steps.
    rollout = jax.jit(net_rollout)
    x_seq, latent_T = rollout(packed, x, u_seq, latent)
    jax.block_until_ready((x_seq, latent_T))
    x_seq_ref, latent_T_ref = net_rollout_ref(params, x, u_seq, latent)
    assert x_seq.shape == (T, B, STATE) and latent_T.shape == (B, H2)
    assert jnp.allclose(x_seq, x_seq_ref, atol=1e-4), "rollout x_seq mismatch"
    assert jnp.allclose(latent_T, latent_T_ref, atol=1e-4), "rollout latent mismatch"

    print("KERNEL_OK")
</pallas_src>

<mosaic_0001>
module attributes {stable_mosaic.version = 11 : i64} {
  func.func @kernel(%arg0: i32, %arg1: memref<2x4xf32, #tpu.memory_space<vmem>>, %arg2: memref<1x2x2xf32, #tpu.memory_space<vmem>>, %arg3: memref<2x32xf32, #tpu.memory_space<vmem>>, %arg4: memref<6x32xf32, #tpu.memory_space<vmem>>, %arg5: memref<64x32xf32, #tpu.memory_space<vmem>>, %arg6: memref<32x4xf32, #tpu.memory_space<vmem>>, %arg7: memref<1x68xf32, #tpu.memory_space<vmem>>, %arg8: memref<1x2x4xf32, #tpu.memory_space<vmem>>, %arg9: memref<2x32xf32, #tpu.memory_space<vmem>>, %arg10: memref<2x4xf32, #tpu.memory_space<vmem>>, %arg11: memref<2x32xf32, #tpu.memory_space<vmem>>) attributes {dimension_semantics = [#tpu.dimension_semantics<arbitrary>], iteration_bounds = array<i64: 1>, scalar_prefetch = 0 : i64, scratch_operands = 2 : i64, tpu.core_type = #tpu.core_type<tc>, window_params = [{pipeline_mode = #tpu.pipeline_mode<synchronous>, transform_indices = @transform_0, window_bounds = array<i64: 2, 4>}, {transform_indices = @transform_1, window_bounds = array<i64: 1, 2, 2>}, {pipeline_mode = #tpu.pipeline_mode<synchronous>, transform_indices = @transform_2, window_bounds = array<i64: 2, 32>}, {pipeline_mode = #tpu.pipeline_mode<synchronous>, transform_indices = @transform_3, window_bounds = array<i64: 6, 32>}, {pipeline_mode = #tpu.pipeline_mode<synchronous>, transform_indices = @transform_4, window_bounds = array<i64: 64, 32>}, {pipeline_mode = #tpu.pipeline_mode<synchronous>, transform_indices = @transform_5, window_bounds = array<i64: 32, 4>}, {pipeline_mode = #tpu.pipeline_mode<synchronous>, transform_indices = @transform_6, window_bounds = array<i64: 1, 68>}, {transform_indices = @transform_7, window_bounds = array<i64: 1, 2, 4>}, {pipeline_mode = #tpu.pipeline_mode<synchronous>, transform_indices = @transform_8, window_bounds = array<i64: 2, 32>}]} {
    %c0_i32 = arith.constant 0 : i32
    %0 = arith.cmpi eq, %arg0, %c0_i32 : i32
    %1 = arith.extui %0 : i1 to i32
    %c0_i32_0 = arith.constant 0 : i32
    %2 = arith.cmpi ne, %1, %c0_i32_0 : i32
    scf.if %2 {
      %c0_26 = arith.constant 0 : index
      %c0_27 = arith.constant 0 : index
      %34 = vector.load %arg1[%c0_26, %c0_27] : memref<2x4xf32, #tpu.memory_space<vmem>>, vector<2x4xf32>
      %c0_28 = arith.constant 0 : index
      %c0_29 = arith.constant 0 : index
      %35 = vector.load %arg10[%c0_28, %c0_29] : memref<2x4xf32, #tpu.memory_space<vmem>>, vector<2x4xf32>
      tpu.vector_store %arg10[%c0_28, %c0_29], %34 {strides = array<i32>} : memref<2x4xf32, #tpu.memory_space<vmem>>, vector<2x4xf32>,
      %c0_30 = arith.constant 0 : index
      %c0_31 = arith.constant 0 : index
      %36 = vector.load %arg3[%c0_30, %c0_31] : memref<2x32xf32, #tpu.memory_space<vmem>>, vector<2x32xf32>
      %c0_32 = arith.constant 0 : index
      %c0_33 = arith.constant 0 : index
      %37 = vector.load %arg11[%c0_32, %c0_33] : memref<2x32xf32, #tpu.memory_space<vmem>>, vector<2x32xf32>
      tpu.vector_store %arg11[%c0_32, %c0_33], %36 {strides = array<i32>} : memref<2x32xf32, #tpu.memory_space<vmem>>, vector<2x32xf32>,
    } else {
    }
    %c0 = arith.constant 0 : index
    %c0_1 = arith.constant 0 : index
    %3 = vector.load %arg10[%c0, %c0_1] : memref<2x4xf32, #tpu.memory_space<vmem>>, vector<2x4xf32>
    %c0_2 = arith.constant 0 : index
    %c0_3 = arith.constant 0 : index
    %4 = vector.load %arg11[%c0_2, %c0_3] : memref<2x32xf32, #tpu.memory_space<vmem>>, vector<2x32xf32>
    %c0_4 = arith.constant 0 : index
    %c0_5 = arith.constant 0 : index
    %c0_6 = arith.constant 0 : index
    %5 = vector.load %arg2[%c0_4, %c0_5, %c0_6] : memref<1x2x2xf32, #tpu.memory_space<vmem>>, vector<1x2x2xf32>
    %6 = vector.shape_cast %5 : vector<1x2x2xf32> to vector<2x2xf32>
    %c0_7 = arith.constant 0 : index
    %c0_8 = arith.constant 0 : index
    %7 = vector.load %arg7[%c0_7, %c0_8] : memref<1x68xf32, #tpu.memory_space<vmem>>, vector<1x68xf32>
    %8 = vector.extract_strided_slice %7 {offsets = [0, 0], sizes = [1, 32], strides = [1, 1]} : vector<1x68xf32> to vector<1x32xf32>
    %9 = vector.extract_strided_slice %7 {offsets = [0, 32], sizes = [1, 32], strides = [1, 1]} : vector<1x68xf32> to vector<1x32xf32>
    %10 = vector.extract_strided_slice %7 {offsets = [0, 64], sizes = [1, 4], strides = [1, 1]} : vector<1x68xf32> to vector<1x4xf32>
    %11 = tpu.concatenate %3, %6 in 1 : vector<2x4xf32>, vector<2x2xf32> -> vector<2x6xf32>
    %c0_9 = arith.constant 0 : index
    %c0_10 = arith.constant 0 : index
    %12 = vector.load %arg4[%c0_9, %c0_10] : memref<6x32xf32, #tpu.memory_space<vmem>>, vector<6x32xf32>
    %cst = arith.constant dense<0.000000e+00> : vector<2x32xf32>
    %13 = tpu.matmul %11, %12, %cst {dimension_numbers = #tpu.dot_dimension_numbers<[1], [0], [0], [1], [0, 0, 1, 1], [], []>} : vector<2x6xf32>, vector<6x32xf32>, vector<2x32xf32> -> vector<2x32xf32>
    %14 = vector.broadcast %8 : vector<1x32xf32> to vector<2x32xf32>
    %15 = arith.addf %13, %14 : vector<2x32xf32>
    %16 = math.tanh %15 : vector<2x32xf32>
    %17 = tpu.concatenate %16, %4 in 1 : vector<2x32xf32>, vector<2x32xf32> -> vector<2x64xf32>
    %c0_11 = arith.constant 0 : index
    %c0_12 = arith.constant 0 : index
    %18 = vector.load %arg5[%c0_11, %c0_12] : memref<64x32xf32, #tpu.memory_space<vmem>>, vector<64x32xf32>
    %cst_13 = arith.constant dense<0.000000e+00> : vector<2x32xf32>
    %19 = tpu.matmul %17, %18, %cst_13 {dimension_numbers = #tpu.dot_dimension_numbers<[1], [0], [0], [1], [0, 0, 1, 1], [], []>} : vector<2x64xf32>, vector<64x32xf32>, vector<2x32xf32> -> vector<2x32xf32>
    %20 = vector.broadcast %9 : vector<1x32xf32> to vector<2x32xf32>
    %21 = arith.addf %19, %20 : vector<2x32xf32>
    %22 = math.tanh %21 : vector<2x32xf32>
    %c0_14 = arith.constant 0 : index
    %c0_15 = arith.constant 0 : index
    %23 = vector.load %arg6[%c0_14, %c0_15] : memref<32x4xf32, #tpu.memory_space<vmem>>, vector<32x4xf32>
    %cst_16 = arith.constant dense<0.000000e+00> : vector<2x4xf32>
    %24 = tpu.matmul %22, %23, %cst_16 {dimension_numbers = #tpu.dot_dimension_numbers<[1], [0], [0], [1], [0, 0, 1, 1], [], []>} : vector<2x32xf32>, vector<32x4xf32>, vector<2x4xf32> -> vector<2x4xf32>
    %25 = arith.addf %3, %24 : vector<2x4xf32>
    %26 = vector.broadcast %10 : vector<1x4xf32> to vector<2x4xf32>
    %27 = arith.addf %25, %26 : vector<2x4xf32>
    %c0_17 = arith.constant 0 : index
    %c0_18 = arith.constant 0 : index
    %28 = vector.load %arg10[%c0_17, %c0_18] : memref<2x4xf32, #tpu.memory_space<vmem>>, vector<2x4xf32>
    tpu.vector_store %arg10[%c0_17, %c0_18], %27 {strides = array<i32>} : memref<2x4xf32, #tpu.memory_space<vmem>>, vector<2x4xf32>,
    %c0_19 = arith.constant 0 : index
    %c0_20 = arith.constant 0 : index
    %29 = vector.load %arg11[%c0_19, %c0_20] : memref<2x32xf32, #tpu.memory_space<vmem>>, vector<2x32xf32>
    tpu.vector_store %arg11[%c0_19, %c0_20], %22 {strides = array<i32>} : memref<2x32xf32, #tpu.memory_space<vmem>>, vector<2x32xf32>,
    %c0_21 = arith.constant 0 : index
    %c0_22 = arith.constant 0 : index
    %c0_23 = arith.constant 0 : index
    %30 = vector.load %arg8[%c0_21, %c0_22, %c0_23] : memref<1x2x4xf32, #tpu.memory_space<vmem>>, vector<1x2x4xf32>
    %31 = vector.shape_cast %30 : vector<1x2x4xf32> to vector<2x4xf32>
    %32 = vector.shape_cast %27 : vector<2x4xf32> to vector<1x2x4xf32>
    tpu.vector_store %arg8[%c0_21, %c0_22, %c0_23], %32 {strides = array<i32>} : memref<1x2x4xf32, #tpu.memory_space<vmem>>, vector<1x2x4xf32>,
    %c0_24 = arith.constant 0 : index
    %c0_25 = arith.constant 0 : index
    %33 = vector.load %arg9[%c0_24, %c0_25] : memref<2x32xf32, #tpu.memory_space<vmem>>, vector<2x32xf32>
    tpu.vector_store %arg9[%c0_24, %c0_25], %22 {strides = array<i32>} : memref<2x32xf32, #tpu.memory_space<vmem>>, vector<2x32xf32>,
    return
  }
  func.func @transform_0(%arg0: i32) -> (i32, i32) {
    %c0_i32 = arith.constant 0 : i32
    %c0_i32_0 = arith.constant 0 : i32
    %c0_i32_1 = arith.constant 0 : i32
    return %c0_i32, %c0_i32_0 : i32, i32
  }
  func.func @transform_1(%arg0: i32) -> (i32, i32, i32) {
    %c0_i32 = arith.constant 0 : i32
    %c0_i32_0 = arith.constant 0 : i32
    %c0_i32_1 = arith.constant 0 : i32
    return %arg0, %c0_i32, %c0_i32_0 : i32, i32, i32
  }
  func.func @transform_2(%arg0: i32) -> (i32, i32) {
    %c0_i32 = arith.constant 0 : i32
    %c0_i32_0 = arith.constant 0 : i32
    %c0_i32_1 = arith.constant 0 : i32
    return %c0_i32, %c0_i32_0 : i32, i32
  }
  func.func @transform_3(%arg0: i32) -> (i32, i32) {
    %c0_i32 = arith.constant 0 : i32
    %c0_i32_0 = arith.constant 0 : i32
    %c0_i32_1 = arith.constant 0 : i32
    return %c0_i32, %c0_i32_0 : i32, i32
  }
  func.func @transform_4(%arg0: i32) -> (i32, i32) {
    %c0_i32 = arith.constant 0 : i32
    %c0_i32_0 = arith.constant 0 : i32
    %c0_i32_1 = arith.constant 0 : i32
    return %c0_i32, %c0_i32_0 : i32, i32
  }
  func.func @transform_5(%arg0: i32) -> (i32, i32) {
    %c0_i32 = arith.constant 0 : i32
    %c0_i32_0 = arith.constant 0 : i32
    %c0_i32_1 = arith.constant 0 : i32
    return %c0_i32, %c0_i32_0 : i32, i32
  }
  func.func @transform_6(%arg0: i32) -> (i32, i32) {
    %c0_i32 = arith.constant 0 : i32
    %c0_i32_0 = arith.constant 0 : i32
    %c0_i32_1 = arith.constant 0 : i32
    return %c0_i32, %c0_i32_0 : i32, i32
  }
  func.func @transform_7(%arg0: i32) -> (i32, i32, i32) {
    %c0_i32 = arith.constant 0 : i32
    %c0_i32_0 = arith.constant 0 : i32
    %c0_i32_1 = arith.constant 0 : i32
    return %arg0, %c0_i32, %c0_i32_0 : i32, i32, i32
  }
  func.func @transform_8(%arg0: i32) -> (i32, i32) {
    %c0_i32 = arith.constant 0 : i32
    %c0_i32_0 = arith.constant 0 : i32
    %c0_i32_1 = arith.constant 0 : i32
    return %c0_i32, %c0_i32_0 : i32, i32
  }
}

</mosaic_0001>

<bundles_post_ra>
// kernel: net_forward.1
= control target key start
LH: loop header
LB: loop body
LE: loop exit
PB: predicated region body
PF: predicated region fallthrough
CT: control target
= control target key end

     0   :  { %vm34_vm0 = vcmask 25600   ;;  %s443_s29 = smov 4   ;;  %v444_v1 = vmov 0.0   ;;  %vm60_vm1 = vcmask 1045504   ;;  %vm445_vm2 = vmmov 0   ;;  %s573_s0 = inlined_call_operand.vmem [shape: f32[2,4], index: 0, kind: input, shape index: {}]   ;;  %s574_s1 = inlined_call_operand.vmem [shape: f32[1,2,2], index: 1, kind: input, shape index: {}]   ;;  %s575_s2 = inlined_call_operand.vmem [shape: f32[2,32], index: 2, kind: input, shape index: {}, may-alias: {2,8}]   ;;  %s576_s3 = inlined_call_operand.vmem [shape: f32[6,32], index: 3, kind: input, shape index: {}]   ;;  %s577_s4 = inlined_call_operand.vmem [shape: f32[64,32], index: 4, kind: input, shape index: {}]   ;;  %s578_s5 = inlined_call_operand.vmem [shape: f32[32,4], index: 5, kind: input, shape index: {}]   ;;  %s579_s6 = inlined_call_operand.vmem [shape: f32[1,68], index: 6, kind: input, shape index: {}]   ;;  %s580_s7 = inlined_call_operand.hbm [shape: f32[1,2,4], index: 7, kind: output, shape index: {0}]   ;;  %s581_s8 = inlined_call_operand.vmem [shape: f32[2,32], index: 8, kind: output, shape index: {1}, may-alias: {2,8}]  }
   0x1   :  { %v41_v0 = vld [vmem:[%s574_s1] sm:$0x3]  ;;  %354 = vmatprep.subr.mxu0 %v444_v1  ;;  %356 = vmatprep.mubr.msk.f32.mxu0 %vm445_vm2, %v444_v1  ;;  %vm37_vm3 = vcmask 254976   ;;  %v446_v5 = vmov 0.0|0.0  }
   0x2   :  { %44 = vrot.lane.b32.xlu0 %v41_v0, %s443_s29  ;;  %v33_v2 = vld [vmem:[%s573_s0] sm:$0x3]  ;;  %389 = vmatprep.subr.bf16.mxu1 %v446_v5 }
   0x3   :  { %v49_v3 = vld [vmem:[%s576_s3] sm:$0x3f]  ;;  %35 = vst.msk [vmem:[#allocation2] sm:$0x3] %vm34_vm0, %v33_v2  ;;  %375 = vmatprep.mubr.msk.f32.mxu1 %vm445_vm2, %v444_v1 }
   0x4   :  { %355 = vmatpush3.msk.msra.mxu0 %vm60_vm1, %v49_v3  ;;  %v36_v4 = vld [vmem:[%s575_s2] sm:$0x3] }
   0x5   :  { %38 = vst.msk [vmem:[#allocation3] sm:$0x3] %vm37_vm3, %v36_v4 }
   0x6   :  { %14 = vsyncpa [#allocation5], 0  ;;  %401 = vmatprep.subr.bf16.mxu0 %v446_v5  ;;  %s447_s0 = smov 32   ;;  %vm47_vm4 = vcmask 31744   ;;  %vm56_vm5 = vcmask 48128   ;;  %v141_v10 = vld [vmem:[%s577_s4] sm:$0xff] }
   0x7   :  { %v142_v11 = vld [vmem:[%s577_s4 + $0x8] sm:$0xff]  ;;  %v143_v13 = vld [vmem:[%s577_s4 + $0x10] sm:$0xff]  ;;  %v144_v14 = vld [vmem:[%s577_s4 + $0x18] sm:$0xff]  ;;  %s448_s29 = smov 96   ;;  %vm139_vm6 = vcmask 261120   ;;  %vm152_vm7 = vcmask 523264  }
   0x8   :  { %v390_v12 = vpack.c.bf16 %v142_v11, %v141_v10  ;;  %v393_v15 = vpack.c.bf16 %v144_v14, %v143_v13  ;;  %v145_v16 = vld [vmem:[%s577_s4 + $0x20] sm:$0xff]  ;;  %v146_v17 = vld [vmem:[%s577_s4 + $0x28] sm:$0xff]  ;;  %v147_v19 = vld [vmem:[%s577_s4 + $0x30] sm:$0xff] }
   0x9   :  { %v396_v18 = vpack.c.bf16 %v146_v17, %v145_v16  ;;  %v148_v20 = vld [vmem:[%s577_s4 + $0x38] sm:$0xff]  ;;  %v333_v22 = vld [vmem:[%s579_s6] ss:$0 sm:$0xff]  ;;  %v228_v30 = vld [vmem:[%s578_s5 + $0x8] sm:$0xff] }
   0xa   :  { %v39_v7 = vld [vmem:[#allocation2] sm:$0x3]  ;;  %391 = vmatpush3.bf16.msra.mxu1 %v390_v12  ;;  %v399_v21 = vpack.c.bf16 %v148_v20, %v147_v19  ;;  %149 = vrot.lane.b32.xlu1 %v333_v22, %s448_s29  ;;  %v229_v32 = vld [vmem:[%s578_s5 + $0x10] sm:$0xff]  ;;  %v230_v33 = vld [vmem:[%s578_s5 + $0x18] sm:$0xff] }
   0xb   :  { %392 = vmatprep.subr.bf16.mxu1 %v446_v5  ;;  %v227_v29 = vld [vmem:[%s578_s5] sm:$0xff]  ;;  %v405_v34 = vpack.c.bf16 %v230_v33, %v229_v32  ;;  %s450_s5 = smov [#allocation4]  }
   0xc   :  { %v40_v6 = vld [vmem:[#allocation3] sm:$0x3]  ;;  %v402_v31 = vpack.c.bf16 %v228_v30, %v227_v29  ;;  %s321_s13 = sshll.u32 %s450_s5, 4  ;;  %s322_s13 = int_to_ptr.vmem [resolvable:$true] %s321_s13 }
   0xd   :  { %136 = vrot.lane.b32.xlu0 %v40_v6, %s447_s0  ;;  %s449_s0 = smov 64   ;;  %s419_s14 = scalar_lea.vmem %s322_s13, 32 }
   0xe   :  { %394 = vmatpush3.bf16.msra.mxu1 %v393_v15  ;;  %305 = vrot.lane.b32.xlu1 %v333_v22, %s449_s0  ;;  %p420_p0 = scmp.ne.s32.totalorder %s322_s13, %s419_s14  ;;  %p424_p1 = scmp.lt.s32.totalorder %s322_s13, %s322_s13 }
   0xf   :  { %395 = vmatprep.subr.bf16.mxu1 %v446_v5  ;;  %p425_p2 = scmp.lt.s32.totalorder %s419_s14, %s419_s14 }
  0x11   :  { %p426_p3 = por %p425_p2, %p424_p1 }
  0x12   :  { %397 = vmatpush3.bf16.msra.mxu1 %v396_v18 }
  0x13   :  { %398 = vmatprep.subr.bf16.mxu1 %v446_v5  ;;  %p427_p4 = pnand %p426_p3, %p420_p0 }
  0x16   :  { %400 = vmatpush3.bf16.msra.mxu1 %v399_v21 }
  0x74   :  { %v45_v8 = vpop.permute.xlu0 %44 }
  0x75   :  { %v48_v9 = vsel %vm47_vm4, %v39_v7, %v45_v8 }
  0x76   :  { %357 = vmatmul.mubr.msk.f32.vlgmr.msra.gmra.mrb[0].mxu0 %vm56_vm5, %v48_v9 }
  0x77   :  { %386 = vmatprep.mubr.msk.f32.mxu0 %vm445_vm2, %v444_v1  ;;  %403 = vmatpush3.bf16.msra.mxu0 %v402_v31 }
  0x78   :  { %404 = vmatprep.subr.bf16.mxu0 %v446_v5 }
  0x7b   :  { %406 = vmatpush3.bf16.msra.mxu0 %v405_v34 }
  0x7c   :  { %v150_v35 = vpop.permute.xlu1 %149 }
  0x7f   :  { %v137_v26 = vpop.permute.xlu0 %136 }
  0x80   :  { %v306_v41 = vpop.permute.xlu1 %305 }
 0x149   :  { %v130_v23 = vpop.f32.mrb[0].mxu0 }
 0x14a   :  { %v131_v24 = vadd.f32 %v333_v22, %v130_v23  ;;  %v358_v25 = vpop.f32.mrb[1].mxu0 }
 0x14c   :  { %415 = vtanh.f32 %v131_v24 }
 0x156   :  { %v416_v27 = vpop.eup %415 }
 0x157   :  { %v140_v28 = vsel %vm139_vm6, %v416_v27, %v137_v26 }
 0x158   :  { %376 = vmatmul.mubr.msk.f32.vlgmr.msra.gmra.mrb[0].mxu1 %vm152_vm7, %v140_v28 }
 0x22b   :  { %v222_v36 = vpop.f32.mrb[0].mxu1 }
 0x22c   :  { %v223_v37 = vadd.f32 %v222_v36, %v150_v35  ;;  %v377_v38 = vpop.f32.mrb[1].mxu1 }
 0x22e   :  { %417 = vtanh.f32 %v223_v37 }
 0x238   :  { %v418_v39 = vpop.eup %417 }
 0x239   :  { %312 = vst.msk [vmem:[#allocation3] sm:$0x3] %vm37_vm3, %v418_v39  ;;  %314 = vst.msk [vmem:[%s581_s8] sm:$0x3] %vm37_vm3, %v418_v39  ;;  %387 = vmatmul.mubr.msk.f32.vlgmr.msra.gmra.mrb[2].mxu0 %vm139_vm6, %v418_v39 }
 0x30c   :  { %v300_v40 = vpop.f32.mrb[2].mxu0 }
 0x30d   :  { %v304_v42 = vadd.f32 %v300_v40, %v39_v7  ;;  %v388_v43 = vpop.f32.mrb[3].mxu0 }
 0x30f   :  { %v308_v44 = vadd.f32 %v306_v41, %v304_v42 }
 0x311   :  { %310 = vst.msk [vmem:[#allocation2] sm:$0x3] %vm34_vm0, %v308_v44  ;;  %313 = vst.msk [vmem:[#allocation4] sm:$0x3] %vm34_vm0, %v308_v44 }
 0x312   :  { %430 = shalt.err (!%p427_p4)
}
 0x313   :  { %s431_s16 = scalar_lea.hbm %s580_s7, 32 }
 0x314   :  { %p432_p5 = scmp.ne.s32.totalorder %s580_s7, %s431_s16  ;;  %p435_p6 = scmp.lt.u32.totalorder %s431_s16, %s580_s7 }
 0x316   :  { %p437_p7 = pnand %p435_p6, %p432_p5 }
 0x318   :  { %440 = shalt.err (!%p437_p7)
}
 0x319   :  { %324 = dma.vmem_to_hbm [thread:$0]  %s322_s13, 32, %s580_s7, [#allocation5]  }
 0x31a   :  { %441 = dma.done.wait [#allocation5], 32  }
 0x31b   :  { %442 = vsyncadd [#allocation5], 4294967264 }
 0x31c   :  { %332 = vsyncpa [#allocation5], 1 }

</bundles_post_ra>
